<compile_context>
chip_gen: v5e
topology: v5e:2x2
jax: 0.10.0
libtpu: 0.0.40
codegen_flags: <defaults>
</compile_context>

<pallas_src>
import functools

import jax
import jax.numpy as jnp
from jax.experimental import pallas as pl
from jax.experimental.pallas import tpu as pltpu


def _attention_copy_kernel(x_ref, o_ref, *, zero_lanes):
    """Lane-dense masked copy.

    x_ref / o_ref : (1, 1, n*H) VMEM blocks (one flattened batch row).
    The first `zero_lanes` lanes correspond to timestep t == 0 (whose
    attention weight sum is 0) and are zeroed; everything else is copied
    through (attention weight sum is exactly 1 for t >= 1).
    """
    x = x_ref[...]                                              # (1, 1, nH)
    lane = jax.lax.broadcasted_iota(jnp.int32, x.shape, dimension=2)
    o_ref[...] = jnp.where(lane >= zero_lanes, x, jnp.zeros_like(x))


def attention_forward(x, wm, bm, wv, bv):
    """x: [B, n, H] float32.  Returns [B, n, H*A] (A = wv.shape[0] = 1).

    wm/bm/wv/bv are the attn_mat / attn_vecs parameters; they are accepted for
    drop-in compatibility with the module but cancel out of the forward pass
    (see header), so they are not shipped to the kernel.
    """
    B, n, H = x.shape
    A = wv.shape[0]
    assert A == 1, "kernel implemented for attention_dim == 1 (module default)"
    del wm, bm, bv  # mathematically irrelevant to the output

    nH = n * H * A
    # Lane-dense view: one row of n*H lanes per batch (256 lanes here, a
    # multiple of 128 -> unmasked stores). Last two block dims equal the full
    # array dims, so the (8, 128) tiling constraint is satisfied.
    x_flat = x.reshape(B, 1, nH)

    out = pl.pallas_call(
        functools.partial(_attention_copy_kernel, zero_lanes=H * A),
        out_shape=jax.ShapeDtypeStruct((B, 1, nH), x.dtype),
        grid_spec=pltpu.PrefetchScalarGridSpec(
            num_scalar_prefetch=0,
            grid=(B,),  # >= 2 "parallel" steps -> v7x megacore can shard batches
            in_specs=[pl.BlockSpec((1, 1, nH), lambda b: (b, 0, 0))],
            out_specs=pl.BlockSpec((1, 1, nH), lambda b: (b, 0, 0)),
        ),
        compiler_params=pltpu.CompilerParams(
            dimension_semantics=("parallel",),
        ),
    )(x_flat)
    return out.reshape(B, n, H * A)


def attention_reference(x, wm, bm, wv, bv):
    """Pure-JAX mirror of the PyTorch forward (full projection + prefix-softmax,
    dropout in eval mode). Used to validate the closed-form kernel."""
    B, n, H = x.shape
    A = wv.shape[0]
    h = jnp.tanh(x @ wm.T + bm)
    a = h @ wv.T + bv                               # [B, n, A]
    c = jnp.zeros((B, n, H, A), jnp.float32)
    for t in range(n):
        if t == 0:
            w_avg = jnp.zeros((B, A), jnp.float32)
        else:
            w_avg = jnp.sum(jax.nn.softmax(a[:, :t], axis=1), axis=1)
        a_mat = x[:, t, :, None] * w_avg[:, None, :]
        c = c.at[:, t].set(a_mat)
    return c.reshape(B, n, H * A)


if __name__ == "__main__":
    B, n, H, A = 2, 8, 32, 1   # batch, seq, hidden_size, attention_dim

    key = jax.random.PRNGKey(0)
    kx, kwm, kbm, kwv, kbv = jax.random.split(key, 5)

    x = jax.random.normal(kx, (B, n, H), dtype=jnp.float32)

    # Deterministic init mimicking torch.nn.Linear: U(-1/sqrt(fan_in), 1/sqrt(fan_in))
    bound = 1.0 / jnp.sqrt(jnp.float32(H))
    wm = jax.random.uniform(kwm, (H, H), jnp.float32, -bound, bound)   # attn_mat.weight
    bm = jax.random.uniform(kbm, (H,), jnp.float32, -bound, bound)     # attn_mat.bias
    wv = jax.random.uniform(kwv, (A, H), jnp.float32, -bound, bound)   # attn_vecs.weight
    bv = jax.random.uniform(kbv, (A,), jnp.float32, -bound, bound)     # attn_vecs.bias

    out = attention_forward(x, wm, bm, wv, bv)
    out = jax.block_until_ready(out)

    ref = attention_reference(x, wm, bm, wv, bv)
    assert out.shape == (B, n, H * A), out.shape
    assert jnp.allclose(out, ref, atol=1e-5, rtol=1e-5), "mismatch vs reference"

    print("KERNEL_OK")
</pallas_src>

<mosaic_0001>
module attributes {stable_mosaic.version = 11 : i64} {
  func.func @_attention_copy_kernel(%arg0: i32, %arg1: memref<1x1x256xf32, #tpu.memory_space<vmem>>, %arg2: memref<1x1x256xf32, #tpu.memory_space<vmem>>) attributes {dimension_semantics = [#tpu.dimension_semantics<parallel>], iteration_bounds = array<i64: 2>, scalar_prefetch = 0 : i64, scratch_operands = 0 : i64, tpu.core_type = #tpu.core_type<tc>, window_params = [{transform_indices = @transform_0, window_bounds = array<i64: 1, 1, 256>}, {transform_indices = @transform_1, window_bounds = array<i64: 1, 1, 256>}]} {
    %c0 = arith.constant 0 : index
    %c0_0 = arith.constant 0 : index
    %c0_1 = arith.constant 0 : index
    %0 = vector.load %arg1[%c0, %c0_0, %c0_1] : memref<1x1x256xf32, #tpu.memory_space<vmem>>, vector<1x1x256xf32>
    %1 = tpu.iota {dimensions = array<i32: 2>} : vector<1x1x256xi32>
    %c32_i32 = arith.constant 32 : i32
    %2 = vector.broadcast %c32_i32 : i32 to vector<1x1x256xi32>
    %3 = arith.cmpi sge, %1, %2 : vector<1x1x256xi32>
    %cst = arith.constant 0.000000e+00 : f32
    %4 = vector.broadcast %cst : f32 to vector<1x1x256xf32>
    %5 = arith.select %3, %0, %4 : vector<1x1x256xi1>, vector<1x1x256xf32>
    %c0_2 = arith.constant 0 : index
    %c0_3 = arith.constant 0 : index
    %c0_4 = arith.constant 0 : index
    %6 = vector.load %arg2[%c0_2, %c0_3, %c0_4] : memref<1x1x256xf32, #tpu.memory_space<vmem>>, vector<1x1x256xf32>
    tpu.vector_store %arg2[%c0_2, %c0_3, %c0_4], %5 {strides = array<i32>} : memref<1x1x256xf32, #tpu.memory_space<vmem>>, vector<1x1x256xf32>,
    return
  }
  func.func @transform_0(%arg0: i32) -> (i32, i32, i32) {
    %c0_i32 = arith.constant 0 : i32
    %c0_i32_0 = arith.constant 0 : i32
    %c0_i32_1 = arith.constant 0 : i32
    return %arg0, %c0_i32, %c0_i32_0 : i32, i32, i32
  }
  func.func @transform_1(%arg0: i32) -> (i32, i32, i32) {
    %c0_i32 = arith.constant 0 : i32
    %c0_i32_0 = arith.constant 0 : i32
    %c0_i32_1 = arith.constant 0 : i32
    return %arg0, %c0_i32, %c0_i32_0 : i32, i32, i32
  }
}

</mosaic_0001>

<bundles_post_ra>
// kernel: tpu_custom_call.1
= control target key start
LH: loop header
LB: loop body
LE: loop exit
PB: predicated region body
PF: predicated region fallthrough
CT: control target
= control target key end

     0   :  { %6 = vsyncpa [#allocation3], 0  ;;  %s537_s0 = inlined_call_operand.hbm [shape: f32[2,1,256], index: 0, kind: input, shape index: {}]   ;;  %s538_s1 = inlined_call_operand.hbm [shape: f32[2,1,256], index: 1, kind: output, shape index: {}]  }
   0x1   :  { %8 = vsyncpa [#allocation3 + $0x1], 0 }
   0x2   :  { %9 = vsyncpa [#allocation4], 0 }
   0x3   :  { %11 = vsyncpa [#allocation4 + $0x1], 0  ;;  %s410_s6 = smov 0   ;;  %s412_s7 = smov 0  }
   0x4   :  { %s414_s8 = smov 0   ;;  %s416_s9 = smov 0  }
   0x5 LB: > { %s431_s10 = sadd.s32 4294967295, %s398_s9   ;;  %s244_s11 = sadd.s32 4294967294, %s398_s9   ;;  %s398_s9 = sphi %s416_s9, %s548_s9   ;;  %s394_s8 = sphi %s414_s8, %s547_s8   ;;  %s390_s7 = sphi %s412_s7, %s546_s7   ;;  %s386_s6 = sphi %s410_s6, %s545_s6  }
   0x6   : > { %s435_s12 = sadd.s32 1, %s398_s9   ;;  %s24_s13 = sadd.s32 1, %s394_s8 }
   0x7   : > { %s21_s14 = ssub.s32 %s398_s9, %s435_s12  ;;  %p31_p0 = scmp.ne.s32.totalorder %s394_s8, %s390_s7 }
   0x8   : > { %p22_p1 = scmp.eq.s32.totalorder %s21_s14, 0  ;;  %p32_p2 = scmp.eq.s32.totalorder %s398_s9, 0 }
   0x9   : > { %p37_p3 = scmp.ne.s32.totalorder %s390_s7, %s386_s6  ;;  %p38_p4 = scmp.eq.s32.totalorder %s431_s10, 0 }
   0xa   : > { %s447_s15 = scalar_select %p22_p1, %s394_s8, %s24_s13  }
   0xb   : > { %p449_p5 = por %p32_p2, %p31_p0  ;;  %p453_p6 = por %p38_p4, %p37_p3 }
   0xc   : > { %p61_p7 = scmp.eq.s32.totalorder %s431_s10, 1  ;;  %p67_p8 = scmp.eq.s32.totalorder %s244_s11, 1 }
   0xd   : > { %p268_p10 = scmp.lt.s32.totalorder %s398_s9, 2  ;;  %s87_s20 = sand.u32 1, %s394_s8  }
   0xe   : > { %p460_p11 = por %p61_p7, %p31_p0  ;;  %p464_p12 = por %p67_p8, %p37_p3 }
   0xf   : > { %s248_s21 = sshll.u32 %s398_s9, 1  ;;  %s247_s22 = sshll.u32 %s87_s20, 1 }
  0x10   : > { %s95_s25 = scalar_lea.hbm %s537_s0, %s248_s21  ;;  %s91_s27 = scalar_lea.vmem [#allocation2], %s247_s22 }
  0x11   : > { %s97_s26 = sshll.u32 %s95_s25, 4  ;;  %s99_s28 = sshll.u32 %s91_s27, 4  ;;  %s98_s26 = int_to_ptr.hbm [resolvable:$true] %s97_s26  ;;  %s100_s28 = int_to_ptr.vmem [resolvable:$true] %s99_s28 }
  0x12   : > { %p475_p13 = pnand %p268_p10, %p449_p5  ;;  %p249_p0 = scmp.ge.s32.totalorder %s398_s9, 1 }
  0x13   : > { %p104_p1 = scmp.lt.s32.totalorder %s398_s9, 3  ;;  %s88_s30 = scalar_lea.sflag [#allocation3], %s87_s20 }
  0x14   : > { %s302_s2 = sshra.s32 %s98_s26, 4  ;;  %p306_p3 = pneg %p475_p13  ;;  %s303_s2 = int_to_ptr.hbm [resolvable:$true] %s302_s2 }
  0x15   : > { %s304_s3 = scalar_lea.hbm %s303_s2, 2  ;;  %s309_s11 = scalar_lea.hbm %s537_s0, 4 }
  0x16   : > { %p305_p2 = scmp.ne.s32.totalorder %s303_s2, %s304_s3  ;;  %p310_p5 = scmp.lt.s32.totalorder %s303_s2, %s537_s0 }
  0x17   : > { %p311_p8 = scmp.lt.s32.totalorder %s309_s11, %s304_s3 }
  0x18   : > { %p307_p4 = pnand %p306_p3, %p305_p2 }
  0x19   : > { %p312_p10 = por %p311_p8, %p310_p5 }
  0x1a   : > { %p308_p7 = pneg %p307_p4 }
  0x1c   : > { %p313_p9 = pnand %p312_p10, %p308_p7 }
  0x1e   : > { %316 = shalt.err (!%p313_p9)
}
  0x1f   : > { %263 = dma.hbm_to_vmem [thread:$0]  (!%p475_p13), %s98_s26, 32, %s100_s28, %s88_s30  }
  0x20   : > { %p105_p2 = pnand %p249_p0, %p104_p1 }
  0x21   : > { %s496_s16 = sand.u32 (!%p105_p2), 1, %s390_s7  }
  0x22   : > { %108 = sbr.rel (%p105_p2) target bundleno = 55 (0x37), region = 24  ;;  %s250_s20 = sshll.u32 (!%p105_p2), %s496_s16, 1 }
  0x23   : > { %s111_s21 = scalar_lea.sflag (!%p105_p2), [#allocation3], %s496_s16  ;;  %s114_s22 = scalar_lea.vmem (!%p105_p2), [#allocation2], %s250_s20 }
  0x27   : > { %377 = dma.done.wait (%p453_p6), %s111_s21, 32  }
  0x28   : > { %379 = vsyncadd (%p453_p6), %s111_s21, 4294967264  ;;  %v135_v0 = vlaneseq  ;;  %s253_s23 = sshll.u32 %s431_s10, 1  ;;  %v134_v2 = vld [vmem:[%s114_s22] sm:$0x3]  ;;  %s133_s27 = scalar_lea.vmem [#allocation5], %s250_s20  ;;  %vm150_vm1 = vcmask 1040384  }
  0x29   : > { %s169_s26 = scalar_lea.hbm %s538_s1, %s253_s23  ;;  %v141_v3 = vperm.slane %v134_v2, 0  ;;  %v142_v4 = vperm.slane %v134_v2, 1  ;;  %s171_s28 = sshll.u32 %s133_s27, 4  ;;  %s172_s28 = int_to_ptr.vmem [resolvable:$true] %s171_s28 }
  0x2a   : > { %v136_v1 = vand.u32 127, %v135_v0  ;;  %s173_s29 = sshll.u32 %s169_s26, 4  ;;  %vm155_vm2 = vcmp.lt.s32.totalorder %v135_v0, 256  ;;  %s159_s10 = scalar_lea.sflag [#allocation4], %s496_s16  ;;  %s174_s29 = int_to_ptr.hbm [resolvable:$true] %s173_s29 }
  0x2b   : > { %v149_v6 = vrot.slane %v142_v4, 7  ;;  %s346_s17 = sshra.s32 %s174_s29, 4  ;;  %s352_s4 = scalar_lea.hbm %s538_s1, 4  ;;  %s347_s17 = int_to_ptr.hbm [resolvable:$true] %s346_s17 }
  0x2c   : > { %vm138_vm0 = vcmp.ge.s32.totalorder %v136_v1, 32  ;;  %s348_s30 = scalar_lea.hbm %s347_s17, 2  ;;  %p353_p0 = scmp.lt.s32.totalorder %s347_s17, %s538_s1 }
  0x2d   : > { %v145_v5 = vsel %vm138_vm0, %v141_v3, 0.0  ;;  %p349_p6 = scmp.ne.s32.totalorder %s347_s17, %s348_s30  ;;  %p354_p1 = scmp.lt.s32.totalorder %s352_s4, %s348_s30 }
  0x2e   : > { %v151_v7 = vsel %vm150_vm1, %v145_v5, %v149_v6 }
  0x2f   : > { %157 = vst.msk [vmem:[%s133_s27] sm:$0x3] %vm155_vm2, %v151_v7  ;;  %p350_p9 = pnand %p349_p6, %p460_p11  ;;  %p355_p3 = por %p354_p1, %p353_p0 }
  0x31   : > { %p351_p13 = pneg %p350_p9 }
  0x33   : > { %p356_p4 = pnand %p355_p3, %p351_p13 }
  0x35   : > { %359 = shalt.err (!%p356_p4)
}
  0x36   : > { %258 = dma.vmem_to_hbm [thread:$0]  (%p460_p11), %s172_s28, 32, %s174_s29, %s159_s10  }
  0x37 PF: > { %s185_s13 = sand.u32 1, %s386_s6   ;;  %p544_p7 = scmp.ge.s32.totalorder %s398_s9, 2 }
  0x38   : > { %s186_s14 = scalar_lea.sflag [#allocation4], %s185_s13 }
  0x39   : > { %p265_p5 = pnand %p544_p7, %p464_p12 }
  0x3b   : > { %p266_p8 = pneg %p265_p5 }
  0x3d   : > { %381 = dma.done.wait (%p266_p8), %s186_s14, 32  }
  0x3e   : > { %383 = vsyncadd (%p266_p8), %s186_s14, 4294967264  ;;  %p14_p10 = scmp.ge.s32.totalorder %s435_s12, 4   ;;  %s545_s6 = smov %s390_s7 }
  0x3f   : > { %s546_s7 = smov %s394_s8  ;;  %s547_s8 = smov %s447_s15 }
  0x40   : > { %s548_s9 = smov %s435_s12  ;;  %16 = sbr.rel (!%p14_p10) target bundleno = 5 (0x5), region = 69 }
  0x45   :  { %192 = vsyncpa [#allocation3], 1 }
  0x46   :  { %194 = vsyncpa [#allocation3 + $0x1], 1 }
  0x47   :  { %195 = vsyncpa [#allocation4], 1 }
  0x48   :  { %197 = vsyncpa [#allocation4 + $0x1], 1 }

</bundles_post_ra>
